<compile_context>
chip_gen: v7x
topology: tpu7x:2x2x1
jax: 0.10.0
libtpu: 0.0.40
codegen_flags: <defaults>
</compile_context>

<pallas_src>
import jax
import jax.numpy as jnp
from jax.experimental import pallas as pl
from jax.experimental.pallas import tpu as pltpu

LANE = 128      # lane width / padded hidden & output width
SUBLANE = 8     # f32 sublane count
HID = 20        # true hidden width  (Linear(in_feats, 20))
OUT = 10        # true output width  (Linear(20, 10))


def _round_up(n, m):
    return ((n + m - 1) // m) * m


def feedforward_kernel(x_ref, w1t_ref, w2t_ref, o_ref):
    # x_ref:   (TB, F)        flattened input tile
    # w1t_ref: (F, 128)       W1^T zero-padded to 128 lanes (cols 20: are 0)
    # w2t_ref: (128, 128)     W2^T zero-padded (rows 20: and cols 10: are 0)
    # o_ref:   (TB, 128)      lane-dense output tile; caller slices [:, :10]
    x = x_ref[...]
    h = jnp.dot(x, w1t_ref[...], preferred_element_type=jnp.float32)
    # LeakyReLU, default negative_slope = 0.01 (kept in f32).
    h = jnp.where(h > 0, h, 0.01 * h)
    y = jnp.dot(h, w2t_ref[...], preferred_element_type=jnp.float32)
    o_ref[...] = y.astype(o_ref.dtype)


def feedforward(x_nchw, w1, w2, *, max_batch_tile=512):
    """x_nchw: (B, C, H, W) f32; w1: (20, F) torch layout; w2: (10, 20)."""
    B = x_nchw.shape[0]
    F = w1.shape[1]
    x_flat = x_nchw.reshape(B, F).astype(jnp.float32)   # == torch x.view(bs, -1)

    # Lane-dense, zero-padded weights (pads contribute exactly zero).
    w1t = jnp.zeros((F, LANE), jnp.float32).at[:, :HID].set(w1.T.astype(jnp.float32))
    w2t = jnp.zeros((LANE, LANE), jnp.float32).at[:HID, :OUT].set(w2.T.astype(jnp.float32))

    # Batch tile: small B -> single tile padded to a sublane multiple;
    # large B -> 512-row tiles so the grid pipelines and shards across TCs.
    TB = min(_round_up(max_batch_tile, SUBLANE), _round_up(B, SUBLANE))
    B_pad = _round_up(B, TB)
    if B_pad != B:
        x_flat = jnp.pad(x_flat, ((0, B_pad - B), (0, 0)))

    grid = (B_pad // TB,)

    out = pl.pallas_call(
        feedforward_kernel,
        out_shape=jax.ShapeDtypeStruct((B_pad, LANE), jnp.float32),
        grid=grid,
        in_specs=[
            pl.BlockSpec((TB, F), lambda i: (i, 0)),        # streamed x tile
            pl.BlockSpec((F, LANE), lambda i: (0, 0)),      # W1^T, VMEM-resident
            pl.BlockSpec((LANE, LANE), lambda i: (0, 0)),   # W2^T, VMEM-resident
        ],
        out_specs=pl.BlockSpec((TB, LANE), lambda i: (i, 0)),
        compiler_params=pltpu.CompilerParams(
            dimension_semantics=("parallel",),              # batch axis is parallel
        ),
    )(x_flat, w1t, w2t)

    # Slice away batch padding and the lane padding beyond the 10 real outputs.
    return out[:B, :OUT]


if __name__ == "__main__":
    # in_shp = (B, C, H, W) = (2, 4, 16, 16)  ->  in_feats = 4*16*16 = 1024
    B, C, H, W = 2, 4, 16, 16
    in_feats = C * H * W

    key = jax.random.PRNGKey(0)
    kx, k1, k2 = jax.random.split(key, 3)

    x = jax.random.normal(kx, (B, C, H, W), dtype=jnp.float32)
    # Torch Linear weight layout: (out_features, in_features).
    w1 = jax.random.normal(k1, (20, in_feats), dtype=jnp.float32) * 0.02
    w2 = jax.random.normal(k2, (10, 20), dtype=jnp.float32) * 0.1

    y = feedforward(x, w1, w2)
    y = jax.block_until_ready(y)

    # Pure-JAX reference check.
    x_flat = x.reshape(B, -1)
    h_ref = x_flat @ w1.T
    h_ref = jnp.where(h_ref > 0, h_ref, 0.01 * h_ref)
    y_ref = h_ref @ w2.T
    assert y.shape == (B, 10), f"bad output shape {y.shape}"
    assert jnp.allclose(y, y_ref, atol=1e-4, rtol=1e-4), "mismatch vs reference"

    print("KERNEL_OK")
</pallas_src>

<mosaic_0001>
module attributes {stable_mosaic.version = 11 : i64} {
  func.func @feedforward_kernel(%arg0: i32, %arg1: memref<8x1024xf32, #tpu.memory_space<vmem>>, %arg2: memref<1024x128xf32, #tpu.memory_space<vmem>>, %arg3: memref<128x128xf32, #tpu.memory_space<vmem>>, %arg4: memref<8x128xf32, #tpu.memory_space<vmem>>) attributes {dimension_semantics = [#tpu.dimension_semantics<parallel>], iteration_bounds = array<i64: 1>, scalar_prefetch = 0 : i64, scratch_operands = 0 : i64, tpu.core_type = #tpu.core_type<tc>, window_params = [{transform_indices = @transform_0, window_bounds = array<i64: 8, 1024>}, {pipeline_mode = #tpu.pipeline_mode<synchronous>, transform_indices = @transform_1, window_bounds = array<i64: 1024, 128>}, {pipeline_mode = #tpu.pipeline_mode<synchronous>, transform_indices = @transform_2, window_bounds = array<i64: 128, 128>}, {transform_indices = @transform_3, window_bounds = array<i64: 8, 128>}]} {
    %c0 = arith.constant 0 : index
    %c0_0 = arith.constant 0 : index
    %0 = vector.load %arg1[%c0, %c0_0] : memref<8x1024xf32, #tpu.memory_space<vmem>>, vector<8x1024xf32>
    %c0_1 = arith.constant 0 : index
    %c0_2 = arith.constant 0 : index
    %1 = vector.load %arg2[%c0_1, %c0_2] : memref<1024x128xf32, #tpu.memory_space<vmem>>, vector<1024x128xf32>
    %cst = arith.constant dense<0.000000e+00> : vector<8x128xf32>
    %2 = tpu.matmul %0, %1, %cst {dimension_numbers = #tpu.dot_dimension_numbers<[1], [0], [0], [1], [0, 0, 1, 1], [], []>} : vector<8x1024xf32>, vector<1024x128xf32>, vector<8x128xf32> -> vector<8x128xf32>
    %cst_3 = arith.constant 0.000000e+00 : f32
    %3 = vector.broadcast %cst_3 : f32 to vector<8x128xf32>
    %4 = arith.cmpf ogt, %2, %3 : vector<8x128xf32>
    %cst_4 = arith.constant 0.00999999977 : f32
    %5 = vector.broadcast %cst_4 : f32 to vector<8x128xf32>
    %6 = arith.mulf %5, %2 : vector<8x128xf32>
    %7 = arith.select %4, %2, %6 : vector<8x128xi1>, vector<8x128xf32>
    %c0_5 = arith.constant 0 : index
    %c0_6 = arith.constant 0 : index
    %8 = vector.load %arg3[%c0_5, %c0_6] : memref<128x128xf32, #tpu.memory_space<vmem>>, vector<128x128xf32>
    %cst_7 = arith.constant dense<0.000000e+00> : vector<8x128xf32>
    %9 = tpu.matmul %7, %8, %cst_7 {dimension_numbers = #tpu.dot_dimension_numbers<[1], [0], [0], [1], [0, 0, 1, 1], [], []>} : vector<8x128xf32>, vector<128x128xf32>, vector<8x128xf32> -> vector<8x128xf32>
    %c0_8 = arith.constant 0 : index
    %c0_9 = arith.constant 0 : index
    %10 = vector.load %arg4[%c0_8, %c0_9] : memref<8x128xf32, #tpu.memory_space<vmem>>, vector<8x128xf32>
    tpu.vector_store %arg4[%c0_8, %c0_9], %9 {strides = array<i32>} : memref<8x128xf32, #tpu.memory_space<vmem>>, vector<8x128xf32>,
    return
  }
  func.func @transform_0(%arg0: i32) -> (i32, i32) {
    %c0_i32 = arith.constant 0 : i32
    %c0_i32_0 = arith.constant 0 : i32
    return %arg0, %c0_i32 : i32, i32
  }
  func.func @transform_1(%arg0: i32) -> (i32, i32) {
    %c0_i32 = arith.constant 0 : i32
    %c0_i32_0 = arith.constant 0 : i32
    %c0_i32_1 = arith.constant 0 : i32
    return %c0_i32, %c0_i32_0 : i32, i32
  }
  func.func @transform_2(%arg0: i32) -> (i32, i32) {
    %c0_i32 = arith.constant 0 : i32
    %c0_i32_0 = arith.constant 0 : i32
    %c0_i32_1 = arith.constant 0 : i32
    return %c0_i32, %c0_i32_0 : i32, i32
  }
  func.func @transform_3(%arg0: i32) -> (i32, i32) {
    %c0_i32 = arith.constant 0 : i32
    %c0_i32_0 = arith.constant 0 : i32
    return %arg0, %c0_i32 : i32, i32
  }
}

</mosaic_0001>

<bundles_post_ra>
// kernel: tpu_custom_call.1
= control target key start
LH: loop header
LB: loop body
LE: loop exit
PB: predicated region body
PF: predicated region fallthrough
CT: control target
= control target key end

     0   :  { %8 = vsyncpa [#allocation3], 0  ;;  %s1106_s0 = inlined_call_operand.hbm [shape: f32[8,1024], index: 0, kind: input, shape index: {}]   ;;  %s1107_s1 = inlined_call_operand.hbm [shape: f32[1024,128], index: 1, kind: input, shape index: {}]   ;;  %s1108_s2 = inlined_call_operand.hbm [shape: f32[128,128], index: 2, kind: input, shape index: {}]   ;;  %s1109_s3 = inlined_call_operand.hbm [shape: f32[8,128], index: 3, kind: output, shape index: {}]  }
   0x1   :  { %9 = vsyncpa [#allocation6], 0 }
   0x2   :  { %10 = vsyncpa [#allocation4], 0  ;;  %s1023_s12 = smov [#allocation5]   ;;  %s929_s16 = scalar_lea.hbm %s1107_s1, 16384 }
   0x3   :  { %s26_s13 = sshll.u32 %s1023_s12, 4  ;;  %p930_p0 = scmp.ne.s32.totalorder %s1107_s1, %s929_s16  ;;  %s27_s13 = int_to_ptr.vmem [resolvable:$true] %s26_s13 }
   0x4   :  { %p933_p1 = scmp.lt.u32.totalorder %s929_s16, %s1107_s1 }
   0x6   :  { %p935_p2 = pnand %p933_p1, %p930_p0 }
   0x8   :  { %938 = shalt.err (!%p935_p2)
}
   0x9   :  { %s939_s21 = scalar_lea.vmem %s27_s13, 16384  ;;  %p944_p4 = scmp.lt.s32.totalorder %s27_s13, %s27_s13 }
   0xa   :  { %p940_p3 = scmp.ne.s32.totalorder %s27_s13, %s939_s21  ;;  %p945_p5 = scmp.lt.s32.totalorder %s939_s21, %s939_s21 }
   0xc   :  { %p946_p6 = por %p945_p5, %p944_p4 }
   0xe   :  { %p947_p7 = pnand %p946_p6, %p940_p3 }
  0x10   :  { %950 = shalt.err (!%p947_p7)
}
  0x11   :  { %s1024_s22 = smov 128   ;;  %s1025_s23 = smov 8  }
  0x12   :  { %32 = dma.hbm_to_vmem [thread:$0]  %s1107_s1, 16384, %s27_s13, [#allocation6], %s1024_s22, %s1024_s22, %s1025_s23  }
  0x13   :  { %s1026_s26 = smov [#allocation2]   ;;  %s1027_s28 = smov [#allocation7]  }
  0x14   :  { %s17_s27 = sshll.u32 %s1026_s26, 4  ;;  %s38_s29 = sshll.u32 %s1027_s28, 4  ;;  %s18_s27 = int_to_ptr.vmem [resolvable:$true] %s17_s27  ;;  %s39_s29 = int_to_ptr.vmem [resolvable:$true] %s38_s29 }
  0x15   :  { %s951_s5 = scalar_lea.hbm %s1106_s0, 1024 }
  0x16   :  { %p952_p8 = scmp.ne.s32.totalorder %s1106_s0, %s951_s5  ;;  %p955_p9 = scmp.lt.u32.totalorder %s951_s5, %s1106_s0 }
  0x18   :  { %p957_p10 = pnand %p955_p9, %p952_p8 }
  0x1a   :  { %960 = shalt.err (!%p957_p10)
}
  0x1b   :  { %s961_s1 = scalar_lea.vmem %s18_s27, 1024  ;;  %p966_p12 = scmp.lt.s32.totalorder %s18_s27, %s18_s27 }
  0x1c   :  { %p962_p11 = scmp.ne.s32.totalorder %s18_s27, %s961_s1  ;;  %p967_p13 = scmp.lt.s32.totalorder %s961_s1, %s961_s1 }
  0x1e   :  { %p968_p0 = por %p967_p13, %p966_p12 }
  0x20   :  { %p969_p1 = pnand %p968_p0, %p962_p11 }
  0x22   :  { %972 = shalt.err (!%p969_p1)
}
  0x23   :  { %20 = dma.hbm_to_vmem [thread:$0]  %s1106_s0, 1024, %s18_s27, [#allocation3]  }
  0x24   :  { %s973_s14 = scalar_lea.hbm %s1108_s2, 2048 }
  0x25   :  { %p974_p2 = scmp.ne.s32.totalorder %s1108_s2, %s973_s14  ;;  %p977_p3 = scmp.lt.u32.totalorder %s973_s14, %s1108_s2 }
  0x27   :  { %p979_p4 = pnand %p977_p3, %p974_p2 }
  0x29   :  { %982 = shalt.err (!%p979_p4)
}
  0x2a   :  { %s983_s19 = scalar_lea.vmem %s39_s29, 2048  ;;  %p988_p6 = scmp.lt.s32.totalorder %s39_s29, %s39_s29 }
  0x2b   :  { %p984_p5 = scmp.ne.s32.totalorder %s39_s29, %s983_s19  ;;  %p989_p7 = scmp.lt.s32.totalorder %s983_s19, %s983_s19 }
  0x2d   :  { %p990_p8 = por %p989_p7, %p988_p6 }
  0x2f   :  { %p991_p9 = pnand %p990_p8, %p984_p5 }
  0x31   :  { %994 = shalt.err (!%p991_p9)
}
  0x32   :  { %44 = dma.hbm_to_vmem [thread:$0]  %s1108_s2, 2048, %s39_s29, [#allocation6], %s1024_s22, %s1024_s22, %s1025_s23  }
  0x33   :  { %1017 = dma.done.wait [#allocation3], 1024  }
  0x34   :  { %1018 = vsyncadd [#allocation3], 4294966272 }
  0x35   :  { %1019 = dma.done.wait [#allocation6], 18432  }
  0x36   :  { %1020 = vsyncadd [#allocation6], 4294948864  ;;  %v78_v0 = vld [vmem:[#allocation5 + $0x80] sm:$0xff]  ;;  %v79_v1 = vld [vmem:[#allocation5 + $0x88] sm:$0xff]  ;;  %vm1029_vm0 = vmmov 0   ;;  %s1031_s2 = smov [#allocation8]  }
  0x37   :  { %v110_v2 = vld [vmem:[#allocation5 + $0x180] sm:$0xff]  ;;  %v768_v3 = vpack.c.bf16 %v79_v1, %v78_v0  ;;  %v111_v4 = vld [vmem:[#allocation5 + $0x188] sm:$0xff]  ;;  %v80_v11 = vld [vmem:[#allocation5 + $0x90] sm:$0xff]  ;;  %s566_s21 = sshll.u32 %s1031_s2, 4  ;;  %s567_s21 = int_to_ptr.vmem [resolvable:$true] %s566_s21 }
  0x38   :  { %v62_v5 = vld [vmem:[#allocation5] sm:$0xff]  ;;  %v63_v6 = vld [vmem:[#allocation5 + $0x8] sm:$0xff]  ;;  %v800_v7 = vpack.c.bf16 %v111_v4, %v110_v2  ;;  %v81_v13 = vld [vmem:[#allocation5 + $0x98] sm:$0xff]  ;;  %s995_s22 = scalar_lea.vmem %s567_s21, 128  ;;  %p1000_p11 = scmp.lt.s32.totalorder %s567_s21, %s567_s21 }
  0x39   :  { %v770_v8 = vpack.c.bf16 %v63_v6, %v62_v5  ;;  %v94_v9 = vld [vmem:[#allocation5 + $0x100] sm:$0xff]  ;;  %v95_v10 = vld [vmem:[#allocation5 + $0x108] sm:$0xff]  ;;  %769 = vmatprep.subr.bf16.mxu0 %v768_v3  ;;  %v112_v14 = vld [vmem:[#allocation5 + $0x190] sm:$0xff]  ;;  %v772_v16 = vpack.c.bf16 %v81_v13, %v80_v11  ;;  %p996_p10 = scmp.ne.s32.totalorder %s567_s21, %s995_s22  ;;  %p1001_p12 = scmp.lt.s32.totalorder %s995_s22, %s995_s22 }
  0x3a   :  { %v802_v12 = vpack.c.bf16 %v95_v10, %v94_v9  ;;  %v113_v15 = vld [vmem:[#allocation5 + $0x198] sm:$0xff]  ;;  %801 = vmatprep.subr.bf16.mxu1 %v800_v7  ;;  %v64_v18 = vld [vmem:[#allocation5 + $0x10] sm:$0xff]  ;;  %v82_v23 = vld [vmem:[#allocation5 + $0xa0] sm:$0xff] }
  0x3b   :  { %771 = vmatpush3.bf16.msra.mxu0 %v770_v8  ;;  %v804_v17 = vpack.c.bf16 %v113_v15, %v112_v14  ;;  %v65_v19 = vld [vmem:[#allocation5 + $0x18] sm:$0xff]  ;;  %v96_v20 = vld [vmem:[#allocation5 + $0x110] sm:$0xff]  ;;  %v83_v24 = vld [vmem:[#allocation5 + $0xa8] sm:$0xff]  ;;  %p1002_p13 = por %p1001_p12, %p1000_p11 }
  0x3c   :  { %803 = vmatpush3.bf16.msra.mxu1 %v802_v12  ;;  %v774_v21 = vpack.c.bf16 %v65_v19, %v64_v18  ;;  %v97_v22 = vld [vmem:[#allocation5 + $0x118] sm:$0xff]  ;;  %773 = vmatprep.subr.bf16.mxu0 %v772_v16  ;;  %v776_v26 = vpack.c.bf16 %v83_v24, %v82_v23  ;;  %v114_v27 = vld [vmem:[#allocation5 + $0x1a0] sm:$0xff]  ;;  %v115_v28 = vld [vmem:[#allocation5 + $0x1a8] sm:$0xff] }
  0x3d   :  { %805 = vmatprep.subr.bf16.mxu1 %v804_v17  ;;  %v806_v25 = vpack.c.bf16 %v97_v22, %v96_v20  ;;  %v66_v29 = vld [vmem:[#allocation5 + $0x20] sm:$0xff]  ;;  %v808_v30 = vpack.c.bf16 %v115_v28, %v114_v27  ;;  %v67_v31 = vld [vmem:[#allocation5 + $0x28] sm:$0xff]  ;;  %v84_v35 = vld [vmem:[#allocation5 + $0xb0] sm:$0xff]  ;;  %p1003_p0 = pnand %p1002_p13, %p996_p10 }
  0x3e   :  { %v98_v32 = vld [vmem:[#allocation5 + $0x120] sm:$0xff]  ;;  %v99_v33 = vld [vmem:[#allocation5 + $0x128] sm:$0xff]  ;;  %v778_v34 = vpack.c.bf16 %v67_v31, %v66_v29  ;;  %v85_v36 = vld [vmem:[#allocation5 + $0xb8] sm:$0xff] }
  0x3f   :  { %775 = vmatpush3.bf16.msra.mxu0 %v774_v21  ;;  %v116_v37 = vld [vmem:[#allocation5 + $0x1b0] sm:$0xff]  ;;  %v810_v38 = vpack.c.bf16 %v99_v33, %v98_v32  ;;  %v780_v39 = vpack.c.bf16 %v85_v36, %v84_v35  ;;  %v117_v40 = vld [vmem:[#allocation5 + $0x1b8] sm:$0xff]  ;;  %v86_v46 = vld [vmem:[#allocation5 + $0xc0] sm:$0xff] }
  0x40   :  { %807 = vmatpush3.bf16.msra.mxu1 %v806_v25  ;;  %777 = vmatprep.subr.bf16.mxu0 %v776_v26  ;;  %v68_v41 = vld [vmem:[#allocation5 + $0x30] sm:$0xff]  ;;  %v69_v42 = vld [vmem:[#allocation5 + $0x38] sm:$0xff]  ;;  %v812_v43 = vpack.c.bf16 %v117_v40, %v116_v37  ;;  %v87_v47 = vld [vmem:[#allocation5 + $0xc8] sm:$0xff] }
  0x41   :  { %809 = vmatprep.subr.bf16.mxu1 %v808_v30  ;;  %v100_v44 = vld [vmem:[#allocation5 + $0x130] sm:$0xff]  ;;  %v101_v45 = vld [vmem:[#allocation5 + $0x138] sm:$0xff]  ;;  %v118_v48 = vld [vmem:[#allocation5 + $0x1c0] sm:$0xff]  ;;  %v782_v50 = vpack.c.bf16 %v69_v42, %v68_v41  ;;  %v784_v52 = vpack.c.bf16 %v87_v47, %v86_v46 }
  0x42   :  { %v119_v49 = vld [vmem:[#allocation5 + $0x1c8] sm:$0xff]  ;;  %v814_v51 = vpack.c.bf16 %v101_v45, %v100_v44  ;;  %v70_v53 = vld [vmem:[#allocation5 + $0x40] sm:$0xff]  ;;  %v88_v58 = vld [vmem:[#allocation5 + $0xd0] sm:$0xff] }
  0x43   :  { %779 = vmatpush3.bf16.msra.mxu0 %v778_v34  ;;  %v71_v54 = vld [vmem:[#allocation5 + $0x48] sm:$0xff]  ;;  %v102_v55 = vld [vmem:[#allocation5 + $0x140] sm:$0xff]  ;;  %v816_v56 = vpack.c.bf16 %v119_v49, %v118_v48  ;;  %v89_v59 = vld [vmem:[#allocation5 + $0xd8] sm:$0xff] }
  0x44   :  { %811 = vmatpush3.bf16.msra.mxu1 %v810_v38  ;;  %781 = vmatprep.subr.bf16.mxu0 %v780_v39  ;;  %v103_v57 = vld [vmem:[#allocation5 + $0x148] sm:$0xff]  ;;  %v120_v60 = vld [vmem:[#allocation5 + $0x1d0] sm:$0xff]  ;;  %v121_v61 = vld [vmem:[#allocation5 + $0x1d8] sm:$0xff]  ;;  %v786_v62 = vpack.c.bf16 %v71_v54, %v70_v53  ;;  %v788_v0 = vpack.c.bf16 %v89_v59, %v88_v58 }
  0x45   :  { %813 = vmatprep.subr.bf16.mxu1 %v812_v43  ;;  %v818_v63 = vpack.c.bf16 %v103_v57, %v102_v55  ;;  %v72_v1 = vld [vmem:[#allocation5 + $0x50] sm:$0xff]  ;;  %v73_v2 = vld [vmem:[#allocation5 + $0x58] sm:$0xff]  ;;  %v820_v4 = vpack.c.bf16 %v121_v61, %v120_v60  ;;  %v90_v6 = vld [vmem:[#allocation5 + $0xe0] sm:$0xff] }
  0x46   :  { %v104_v3 = vld [vmem:[#allocation5 + $0x150] sm:$0xff]  ;;  %v105_v5 = vld [vmem:[#allocation5 + $0x158] sm:$0xff]  ;;  %v91_v7 = vld [vmem:[#allocation5 + $0xe8] sm:$0xff]  ;;  %v790_v10 = vpack.c.bf16 %v73_v2, %v72_v1 }
  0x47   :  { %783 = vmatpush3.bf16.msra.mxu0 %v782_v50  ;;  %v122_v8 = vld [vmem:[#allocation5 + $0x1e0] sm:$0xff]  ;;  %v123_v9 = vld [vmem:[#allocation5 + $0x1e8] sm:$0xff]  ;;  %v822_v13 = vpack.c.bf16 %v105_v5, %v104_v3  ;;  %v792_v14 = vpack.c.bf16 %v91_v7, %v90_v6  ;;  %v57_v17 = vld [vmem:[#allocation2 + $0x18] sm:$0xff] }
  0x48   :  { %815 = vmatpush3.bf16.msra.mxu1 %v814_v51  ;;  %785 = vmatprep.subr.bf16.mxu0 %v784_v52  ;;  %v74_v11 = vld [vmem:[#allocation5 + $0x60] sm:$0xff]  ;;  %v75_v12 = vld [vmem:[#allocation5 + $0x68] sm:$0xff]  ;;  %v824_v18 = vpack.c.bf16 %v123_v9, %v122_v8  ;;  %v92_v20 = vld [vmem:[#allocation5 + $0xf0] sm:$0xff] }
  0x49   :  { %817 = vmatprep.subr.bf16.mxu1 %v816_v56  ;;  %v106_v15 = vld [vmem:[#allocation5 + $0x160] sm:$0xff]  ;;  %v55_v16 = vld [vmem:[#allocation2 + $0x8] sm:$0xff]  ;;  %v93_v21 = vld [vmem:[#allocation5 + $0xf8] sm:$0xff]  ;;  %324 = vmatprep.mubr.f32.mxu1 %v57_v17  ;;  %v794_v24 = vpack.c.bf16 %v75_v12, %v74_v11 }
  0x4a   :  { %v107_v19 = vld [vmem:[#allocation5 + $0x168] sm:$0xff]  ;;  %254 = vmatprep.mubr.f32.mxu0 %v55_v16  ;;  %v124_v22 = vld [vmem:[#allocation5 + $0x1f0] sm:$0xff]  ;;  %v125_v23 = vld [vmem:[#allocation5 + $0x1f8] sm:$0xff]  ;;  %v796_v26 = vpack.c.bf16 %v93_v21, %v92_v20 }
  0x4b   :  { %787 = vmatpush3.bf16.msra.mxu0 %v786_v62  ;;  %v826_v25 = vpack.c.bf16 %v107_v19, %v106_v15  ;;  %v76_v27 = vld [vmem:[#allocation5 + $0x70] sm:$0xff]  ;;  %v77_v28 = vld [vmem:[#allocation5 + $0x78] sm:$0xff]  ;;  %v828_v30 = vpack.c.bf16 %v125_v23, %v124_v22  ;;  %v142_v32 = vld [vmem:[#allocation5 + $0x280] sm:$0xff] }
  0x4c   :  { %819 = vmatpush3.bf16.msra.mxu1 %v818_v63  ;;  %789 = vmatprep.subr.bf16.mxu0 %v788_v0  ;;  %v108_v29 = vld [vmem:[#allocation5 + $0x170] sm:$0xff]  ;;  %v109_v31 = vld [vmem:[#allocation5 + $0x178] sm:$0xff]  ;;  %v143_v33 = vld [vmem:[#allocation5 + $0x288] sm:$0xff]  ;;  %v798_v36 = vpack.c.bf16 %v77_v28, %v76_v27 }
  0x4d   :  { %821 = vmatprep.subr.bf16.mxu1 %v820_v4  ;;  %v174_v34 = vld [vmem:[#allocation5 + $0x380] sm:$0xff]  ;;  %v175_v35 = vld [vmem:[#allocation5 + $0x388] sm:$0xff]  ;;  %v830_v37 = vpack.c.bf16 %v109_v31, %v108_v29  ;;  %v832_v38 = vpack.c.bf16 %v143_v33, %v142_v32  ;;  %v144_v44 = vld [vmem:[#allocation5 + $0x290] sm:$0xff] }
  0x4e   :  { %v126_v39 = vld [vmem:[#allocation5 + $0x200] sm:$0xff]  ;;  %v127_v40 = vld [vmem:[#allocation5 + $0x208] sm:$0xff]  ;;  %v864_v42 = vpack.c.bf16 %v175_v35, %v174_v34  ;;  %v145_v45 = vld [vmem:[#allocation5 + $0x298] sm:$0xff] }
  0x4f   :  { %791 = vmatpush3.bf16.msra.mxu0 %v790_v10  ;;  %v158_v41 = vld [vmem:[#allocation5 + $0x300] sm:$0xff]  ;;  %v159_v43 = vld [vmem:[#allocation5 + $0x308] sm:$0xff]  ;;  %v176_v46 = vld [vmem:[#allocation5 + $0x390] sm:$0xff]  ;;  %v834_v50 = vpack.c.bf16 %v127_v40, %v126_v39  ;;  %v836_v52 = vpack.c.bf16 %v145_v45, %v144_v44 }
  0x50   :  { %823 = vmatpush3.bf16.msra.mxu1 %v822_v13  ;;  %793 = vmatprep.subr.bf16.mxu0 %v792_v14  ;;  %v177_v47 = vld [vmem:[#allocation5 + $0x398] sm:$0xff]  ;;  %v54_v48 = vld [vmem:[#allocation2] sm:$0xff]  ;;  %v56_v49 = vld [vmem:[#allocation2 + $0x10] sm:$0xff]  ;;  %v866_v51 = vpack.c.bf16 %v159_v43, %v158_v41 }
  0x51   :  { %825 = vmatprep.subr.bf16.mxu1 %v824_v18  ;;  %v128_v53 = vld [vmem:[#allocation5 + $0x210] sm:$0xff]  ;;  %v129_v54 = vld [vmem:[#allocation5 + $0x218] sm:$0xff]  ;;  %v868_v56 = vpack.c.bf16 %v177_v47, %v176_v46  ;;  %v146_v58 = vld [vmem:[#allocation5 + $0x2a0] sm:$0xff] }
  0x52   :  { %v160_v55 = vld [vmem:[#allocation5 + $0x310] sm:$0xff]  ;;  %v161_v57 = vld [vmem:[#allocation5 + $0x318] sm:$0xff]  ;;  %v147_v59 = vld [vmem:[#allocation5 + $0x2a8] sm:$0xff]  ;;  %v838_v62 = vpack.c.bf16 %v129_v54, %v128_v53 }
  0x53   :  { %795 = vmatpush3.bf16.msra.mxu0 %v794_v24  ;;  %v178_v60 = vld [vmem:[#allocation5 + $0x3a0] sm:$0xff]  ;;  %v179_v61 = vld [vmem:[#allocation5 + $0x3a8] sm:$0xff]  ;;  %v870_v63 = vpack.c.bf16 %v161_v57, %v160_v55  ;;  %v840_v0 = vpack.c.bf16 %v147_v59, %v146_v58  ;;  %v148_v6 = vld [vmem:[#allocation5 + $0x2b0] sm:$0xff] }
  0x54   :  { %827 = vmatpush3.bf16.msra.mxu1 %v826_v25  ;;  %797 = vmatprep.subr.bf16.mxu0 %v796_v26  ;;  %v130_v1 = vld [vmem:[#allocation5 + $0x220] sm:$0xff]  ;;  %v131_v2 = vld [vmem:[#allocation5 + $0x228] sm:$0xff]  ;;  %v872_v4 = vpack.c.bf16 %v179_v61, %v178_v60  ;;  %v149_v7 = vld [vmem:[#allocation5 + $0x2b8] sm:$0xff] }
  0x55   :  { %829 = vmatprep.subr.bf16.mxu1 %v828_v30  ;;  %v162_v3 = vld [vmem:[#allocation5 + $0x320] sm:$0xff]  ;;  %v163_v5 = vld [vmem:[#allocation5 + $0x328] sm:$0xff]  ;;  %v180_v8 = vld [vmem:[#allocation5 + $0x3b0] sm:$0xff]  ;;  %v842_v10 = vpack.c.bf16 %v131_v2, %v130_v1  ;;  %v844_v12 = vpack.c.bf16 %v149_v7, %v148_v6 }
  0x56   :  { %v181_v9 = vld [vmem:[#allocation5 + $0x3b8] sm:$0xff]  ;;  %v874_v11 = vpack.c.bf16 %v163_v5, %v162_v3  ;;  %v132_v13 = vld [vmem:[#allocation5 + $0x230] sm:$0xff]  ;;  %v150_v18 = vld [vmem:[#allocation5 + $0x2c0] sm:$0xff] }
  0x57   :  { %799 = vmatpush3.bf16.msra.mxu0 %v798_v36  ;;  %v133_v14 = vld [vmem:[#allocation5 + $0x238] sm:$0xff]  ;;  %v164_v15 = vld [vmem:[#allocation5 + $0x330] sm:$0xff]  ;;  %v876_v16 = vpack.c.bf16 %v181_v9, %v180_v8  ;;  %v151_v19 = vld [vmem:[#allocation5 + $0x2c8] sm:$0xff] }
  0x58   :  { %831 = vmatpush3.bf16.msra.mxu1 %v830_v37  ;;  %833 = vmatprep.subr.bf16.mxu0 %v832_v38  ;;  %v165_v17 = vld [vmem:[#allocation5 + $0x338] sm:$0xff]  ;;  %v182_v20 = vld [vmem:[#allocation5 + $0x3c0] sm:$0xff]  ;;  %v183_v21 = vld [vmem:[#allocation5 + $0x3c8] sm:$0xff]  ;;  %v846_v22 = vpack.c.bf16 %v133_v14, %v132_v13  ;;  %v848_v26 = vpack.c.bf16 %v151_v19, %v150_v18 }
  0x59   :  { %865 = vmatprep.subr.bf16.mxu1 %v864_v42  ;;  %v59_v23 = vld [vmem:[#allocation2 + $0x28] sm:$0xff]  ;;  %v61_v24 = vld [vmem:[#allocation2 + $0x38] sm:$0xff]  ;;  %v878_v25 = vpack.c.bf16 %v165_v17, %v164_v15  ;;  %v134_v27 = vld [vmem:[#allocation5 + $0x240] sm:$0xff]  ;;  %v880_v30 = vpack.c.bf16 %v183_v21, %v182_v20 }
  0x5a   :  { %255 = vmatmul.mubr.f32.vlgmr.msra.gmra.mrb[0].mxu0 %v54_v48  ;;  %v135_v28 = vld [vmem:[#allocation5 + $0x248] sm:$0xff]  ;;  %v166_v29 = vld [vmem:[#allocation5 + $0x340] sm:$0xff]  ;;  %v152_v32 = vld [vmem:[#allocation5 + $0x2d0] sm:$0xff] }
  0x5b   :  { %325 = vmatmul.mubr.f32.vlgmr.msra.gmra.mrb[0].mxu1 %v56_v49  ;;  %835 = vmatpush3.bf16.msra.mxu0 %v834_v50  ;;  %v167_v31 = vld [vmem:[#allocation5 + $0x348] sm:$0xff]  ;;  %v153_v33 = vld [vmem:[#allocation5 + $0x2d8] sm:$0xff]  ;;  %v184_v34 = vld [vmem:[#allocation5 + $0x3d0] sm:$0xff]  ;;  %v850_v36 = vpack.c.bf16 %v135_v28, %v134_v27 }
  0x5c   :  { %867 = vmatpush3.bf16.msra.mxu1 %v866_v51  ;;  %837 = vmatprep.subr.bf16.mxu0 %v836_v52  ;;  %v185_v35 = vld [vmem:[#allocation5 + $0x3d8] sm:$0xff]  ;;  %v882_v37 = vpack.c.bf16 %v167_v31, %v166_v29  ;;  %v852_v38 = vpack.c.bf16 %v153_v33, %v152_v32  ;;  %v136_v39 = vld [vmem:[#allocation5 + $0x250] sm:$0xff]  ;;  %v154_v44 = vld [vmem:[#allocation5 + $0x2e0] sm:$0xff]  ;;  %v1030_v33 = vmov 0.0  }
  0x5d   :  { %869 = vmatprep.subr.bf16.mxu1 %v868_v56  ;;  %394 = vmatprep.mubr.f32.mxu0 %v59_v23  ;;  %v137_v40 = vld [vmem:[#allocation5 + $0x258] sm:$0xff]  ;;  %v168_v41 = vld [vmem:[#allocation5 + $0x350] sm:$0xff]  ;;  %v884_v42 = vpack.c.bf16 %v185_v35, %v184_v34  ;;  %v155_v45 = vld [vmem:[#allocation5 + $0x2e8] sm:$0xff] }
  0x5e   :  { %464 = vmatprep.mubr.f32.mxu1 %v61_v24  ;;  %v169_v43 = vld [vmem:[#allocation5 + $0x358] sm:$0xff]  ;;  %v186_v46 = vld [vmem:[#allocation5 + $0x3e0] sm:$0xff]  ;;  %v187_v47 = vld [vmem:[#allocation5 + $0x3e8] sm:$0xff]  ;;  %v854_v48 = vpack.c.bf16 %v137_v40, %v136_v39  ;;  %v856_v50 = vpack.c.bf16 %v155_v45, %v154_v44 }
  0x5f   :  { %839 = vmatpush3.bf16.msra.mxu0 %v838_v62  ;;  %v886_v49 = vpack.c.bf16 %v169_v43, %v168_v41  ;;  %v138_v51 = vld [vmem:[#allocation5 + $0x260] sm:$0xff]  ;;  %v139_v52 = vld [vmem:[#allocation5 + $0x268] sm:$0xff]  ;;  %v888_v54 = vpack.c.bf16 %v187_v47, %v186_v46  ;;  %v156_v56 = vld [vmem:[#allocation5 + $0x2f0] sm:$0xff] }
  0x60   :  { %871 = vmatpush3.bf16.msra.mxu1 %v870_v63  ;;  %841 = vmatprep.subr.bf16.mxu0 %v840_v0  ;;  %v170_v53 = vld [vmem:[#allocation5 + $0x360] sm:$0xff]  ;;  %v171_v55 = vld [vmem:[#allocation5 + $0x368] sm:$0xff]  ;;  %v157_v57 = vld [vmem:[#allocation5 + $0x2f8] sm:$0xff]  ;;  %v858_v60 = vpack.c.bf16 %v139_v52, %v138_v51 }
  0x61   :  { %873 = vmatprep.subr.bf16.mxu1 %v872_v4  ;;  %v188_v58 = vld [vmem:[#allocation5 + $0x3f0] sm:$0xff]  ;;  %v189_v59 = vld [vmem:[#allocation5 + $0x3f8] sm:$0xff]  ;;  %v890_v61 = vpack.c.bf16 %v171_v55, %v170_v53  ;;  %v860_v62 = vpack.c.bf16 %v157_v57, %v156_v56  ;;  %v58_v6 = vld [vmem:[#allocation2 + $0x20] sm:$0xff] }
  0x62   :  { %v140_v63 = vld [vmem:[#allocation5 + $0x270] sm:$0xff]  ;;  %v141_v0 = vld [vmem:[#allocation5 + $0x278] sm:$0xff]  ;;  %v892_v1 = vpack.c.bf16 %v189_v59, %v188_v58  ;;  %v473_v8 = vld [vmem:[#allocation7] sm:$0xff] }
  0x63   :  { %843 = vmatpush3.bf16.msra.mxu0 %v842_v10  ;;  %v172_v2 = vld [vmem:[#allocation5 + $0x370] sm:$0xff]  ;;  %v173_v3 = vld [vmem:[#allocation5 + $0x378] sm:$0xff]  ;;  %v862_v4 = vpack.c.bf16 %v141_v0, %v140_v63  ;;  %v474_v9 = vld [vmem:[#allocation7 + $0x8] sm:$0xff] }
  0x64   :  { %875 = vmatpush3.bf16.msra.mxu1 %v874_v11  ;;  %845 = vmatprep.subr.bf16.mxu0 %v844_v12  ;;  %v894_v5 = vpack.c.bf16 %v173_v3, %v172_v2  ;;  %v60_v7 = vld [vmem:[#allocation2 + $0x30] sm:$0xff]  ;;  %v1028_v11 = vmov 0.0|0.0   ;;  %v897_v12 = vpack.c.bf16 %v474_v9, %v473_v8  ;;  %v476_v13 = vld [vmem:[#allocation7 + $0x18] sm:$0xff]  ;;  %v477_v15 = vld [vmem:[#allocation7 + $0x20] sm:$0xff] }
  0x65   :  { %877 = vmatprep.subr.bf16.mxu1 %v876_v16  ;;  %v475_v10 = vld [vmem:[#allocation7 + $0x10] sm:$0xff]  ;;  %v478_v16 = vld [vmem:[#allocation7 + $0x28] sm:$0xff]  ;;  %v480_v19 = vld [vmem:[#allocation7 + $0x38] sm:$0xff] }
  0x66   :  { %v900_v14 = vpack.c.bf16 %v476_v13, %v475_v10  ;;  %v903_v17 = vpack.c.bf16 %v478_v16, %v477_v15  ;;  %v479_v18 = vld [vmem:[#allocation7 + $0x30] sm:$0xff]  ;;  %v481_v21 = vld [vmem:[#allocation7 + $0x40] sm:$0xff]  ;;  %v486_v28 = vld [vmem:[#allocation7 + $0x68] sm:$0xff] }
  0x67   :  { %847 = vmatpush3.bf16.msra.mxu0 %v846_v22  ;;  %v906_v20 = vpack.c.bf16 %v480_v19, %v479_v18  ;;  %v482_v22 = vld [vmem:[#allocation7 + $0x48] sm:$0xff]  ;;  %v483_v24 = vld [vmem:[#allocation7 + $0x50] sm:$0xff]  ;;  %v485_v27 = vld [vmem:[#allocation7 + $0x60] sm:$0xff] }
  0x68   :  { %879 = vmatpush3.bf16.msra.mxu1 %v878_v25  ;;  %849 = vmatprep.subr.bf16.mxu0 %v848_v26  ;;  %v909_v23 = vpack.c.bf16 %v482_v22, %v481_v21  ;;  %v484_v25 = vld [vmem:[#allocation7 + $0x58] sm:$0xff]  ;;  %v915_v29 = vpack.c.bf16 %v486_v28, %v485_v27 }
  0x69   :  { %881 = vmatprep.subr.bf16.mxu1 %v880_v30  ;;  %v912_v26 = vpack.c.bf16 %v484_v25, %v483_v24  ;;  %v487_v30 = vld [vmem:[#allocation7 + $0x70] sm:$0xff]  ;;  %v488_v31 = vld [vmem:[#allocation7 + $0x78] sm:$0xff] }
  0x6a   :  { %v918_v32 = vpack.c.bf16 %v488_v31, %v487_v30 }
  0x6b   :  { %851 = vmatpush3.bf16.msra.mxu0 %v850_v36 }
  0x6c   :  { %883 = vmatpush3.bf16.msra.mxu1 %v882_v37  ;;  %853 = vmatprep.subr.bf16.mxu0 %v852_v38 }
  0x6d   :  { %885 = vmatprep.subr.bf16.mxu1 %v884_v42 }
  0x6f   :  { %855 = vmatpush3.bf16.msra.mxu0 %v854_v48 }
  0x70   :  { %887 = vmatpush3.bf16.msra.mxu1 %v886_v49  ;;  %857 = vmatprep.subr.bf16.mxu0 %v856_v50 }
  0x71   :  { %889 = vmatprep.subr.bf16.mxu1 %v888_v54 }
  0x73   :  { %859 = vmatpush3.bf16.msra.mxu0 %v858_v60 }
  0x74   :  { %891 = vmatpush3.bf16.msra.mxu1 %v890_v61  ;;  %861 = vmatprep.subr.bf16.mxu0 %v860_v62 }
  0x75   :  { %893 = vmatprep.subr.bf16.mxu1 %v892_v1 }
  0x77   :  { %863 = vmatpush3.bf16.msra.mxu0 %v862_v4 }
  0x78   :  { %895 = vmatpush3.bf16.msra.mxu1 %v894_v5  ;;  %896 = vmatprep.subr.bf16.mxu0 %v1028_v11 }
  0x7a   :  { %395 = vmatmul.mubr.f32.vlgmr.msra.gmra.mrb[2].mxu0 %v58_v6 }
  0x7b   :  { %465 = vmatmul.mubr.f32.vlgmr.msra.gmra.mrb[2].mxu1 %v60_v7  ;;  %898 = vmatpush3.bf16.msra.mxu0 %v897_v12 }
  0x7c   :  { %899 = vmatprep.subr.bf16.mxu0 %v1028_v11  ;;  %765 = vmatprep.mubr.msk.f32.mxu0 %vm1029_vm0, %v1030_v33 }
  0x7f   :  { %901 = vmatpush3.bf16.msra.mxu0 %v900_v14 }
  0x80   :  { %902 = vmatprep.subr.bf16.mxu0 %v1028_v11 }
  0x83   :  { %904 = vmatpush3.bf16.msra.mxu0 %v903_v17 }
  0x84   :  { %905 = vmatprep.subr.bf16.mxu0 %v1028_v11 }
  0x87   :  { %907 = vmatpush3.bf16.msra.mxu0 %v906_v20 }
  0x88   :  { %908 = vmatprep.subr.bf16.mxu0 %v1028_v11 }
  0x8b   :  { %910 = vmatpush3.bf16.msra.mxu0 %v909_v23 }
  0x8c   :  { %911 = vmatprep.subr.bf16.mxu0 %v1028_v11 }
  0x8f   :  { %913 = vmatpush3.bf16.msra.mxu0 %v912_v26 }
  0x90   :  { %914 = vmatprep.subr.bf16.mxu0 %v1028_v11 }
  0x93   :  { %916 = vmatpush3.bf16.msra.mxu0 %v915_v29 }
  0x94   :  { %917 = vmatprep.subr.bf16.mxu0 %v1028_v11 }
  0x97   :  { %919 = vmatpush3.bf16.msra.mxu0 %v918_v32 }
 0x12d   :  { %v608_v34 = vpop.f32.mrb[0].mxu0 }
 0x12e   :  { %v643_v35 = vpop.f32.mrb[0].mxu1  ;;  %v609_v36 = vpop.f32.mrb[1].mxu0 }
 0x12f   :  { %v610_v37 = vadd.f32 %v609_v36, %v608_v34  ;;  %v644_v38 = vpop.f32.mrb[1].mxu1 }
 0x130   :  { %v645_v39 = vadd.f32 %v644_v38, %v643_v35 }
 0x132   :  { %v327_v40 = vadd.f32 %v645_v39, %v610_v37 }
 0x14d   :  { %v678_v41 = vpop.f32.mrb[2].mxu0 }
 0x14e   :  { %v679_v42 = vpop.f32.mrb[3].mxu0  ;;  %v713_v43 = vpop.f32.mrb[2].mxu1 }
 0x14f   :  { %v680_v44 = vadd.f32 %v679_v42, %v678_v41  ;;  %v714_v45 = vpop.f32.mrb[3].mxu1 }
 0x150   :  { %v715_v46 = vadd.f32 %v714_v45, %v713_v43 }
 0x151   :  { %v397_v47 = vadd.f32 %v680_v44, %v327_v40 }
 0x153   :  { %v467_v48 = vadd.f32 %v715_v46, %v397_v47 }
 0x155   :  { %v471_v49 = vmul.f32 0.01, %v467_v48  ;;  %vm470_vm1 = vcmp.gt.f32.partialorder %v467_v48, 0.0 }
 0x157   :  { %v472_v50 = vsel %vm470_vm1, %v467_v48, %v471_v49 }
 0x158   :  { %766 = vmatmul.mubr.f32.vlgmr.msra.gmra.mrb[4].mxu0 %v472_v50 }
 0x22b   :  { %v555_v51 = vpop.f32.mrb[4].mxu0 }
 0x22c   :  { %559 = vst [vmem:[#allocation8] sm:$0xff] %v555_v51  ;;  %v767_v52 = vpop.f32.mrb[5].mxu0 }
 0x22d   :  { %1006 = shalt.err (!%p1003_p0)
}
 0x22e   :  { %s1007_s25 = scalar_lea.hbm %s1109_s3, 128 }
 0x22f   :  { %p1008_p1 = scmp.ne.s32.totalorder %s1109_s3, %s1007_s25  ;;  %p1011_p2 = scmp.lt.u32.totalorder %s1007_s25, %s1109_s3 }
 0x231   :  { %p1013_p3 = pnand %p1011_p2, %p1008_p1 }
 0x233   :  { %1016 = shalt.err (!%p1013_p3)
}
 0x234   :  { %569 = dma.vmem_to_hbm [thread:$0]  %s567_s21, 128, %s1109_s3, [#allocation4]  }
 0x235   :  { %1021 = dma.done.wait [#allocation4], 128  }
 0x236   :  { %1022 = vsyncadd [#allocation4], 4294967168 }
 0x237   :  { %573 = vsyncpa [#allocation3], 1 }
 0x238   :  { %574 = vsyncpa [#allocation6], 1 }
 0x239   :  { %575 = vsyncpa [#allocation4], 1 }

</bundles_post_ra>
